<compile_context>
chip_gen: v6e
topology: v6e:2x2x1
jax: 0.10.0
libtpu: 0.0.40
codegen_flags: <defaults>
</compile_context>

<pallas_src>
import functools
import math

import jax
import jax.numpy as jnp
from jax.experimental import pallas as pl
from jax.experimental.pallas import tpu as pltpu

_LANES = 128
_SUBLANES = 8
_EPS = 1e-7

# dtypes the kernel accepts natively (anything else is cast to f32 once in the
# wrapper).  Native pass-through keeps HBM reads at the input's own width.
_NATIVE_DTYPES = (jnp.dtype(jnp.float32), jnp.dtype(jnp.bfloat16), jnp.dtype(jnp.float16))


def _bce_f32(x, t):
    # torch.clamp(input, 1e-7, 1 - 1e-7); -(t*log(x) + (1-t)*log(1-x)), in f32.
    x = jnp.clip(x, _EPS, 1.0 - _EPS)
    return -(t * jnp.log(x) + (1.0 - t) * jnp.log(1.0 - x))


def _bce_none_kernel(x_ref, t_ref, loss_ref):
    x = x_ref[...].astype(jnp.float32)
    t = t_ref[...].astype(jnp.float32)
    loss_ref[...] = _bce_f32(x, t).astype(loss_ref.dtype)


def _bce_partial_sum_kernel(x_ref, t_ref, psum_ref, *, last_block_rows):
    x = x_ref[...].astype(jnp.float32)
    t = t_ref[...].astype(jnp.float32)
    loss = _bce_f32(x, t)
    # Sublane-group (pure VALU) reduction down to one (8, 128) tile per block;
    # the final cross-lane reduce happens once in the wrapper on a tiny array.
    psum_ref[...] = loss.reshape(-1, _SUBLANES, _LANES).sum(axis=0)
    if last_block_rows is not None:
        # Partial tail block only: mask the out-of-bounds rows.  Runtime-gated
        # with pl.when so the extra iota/compare/select never runs on full
        # blocks.  OOB rows hold unspecified data, but clip keeps them finite
        # and the select discards them, so they cannot pollute the sum.
        @pl.when(pl.program_id(0) == pl.num_programs(0) - 1)
        def _():
            row_ids = jax.lax.broadcasted_iota(jnp.int32, loss.shape, 0)
            masked = jnp.where(row_ids < last_block_rows, loss, 0.0)
            psum_ref[...] = masked.reshape(-1, _SUBLANES, _LANES).sum(axis=0)


def _sublane_multiple(dtype):
    # 4-byte -> 8 sublanes, 2-byte -> 16, 1-byte -> 32.
    return _SUBLANES * max(1, 4 // jnp.dtype(dtype).itemsize)


def custom_bce_loss(inp, target, reduction="mean", *, max_block_rows=4096):
    if reduction not in ("none", "mean", "sum"):
        raise ValueError("Reduction must be 'none', 'mean', or 'sum'")
    if inp.shape != target.shape:
        raise ValueError("input and target must have the same shape")

    orig_shape = inp.shape
    n = math.prod(orig_shape) if orig_shape else 1

    # Loss dtype follows the promoted floating dtype of the operands (torch
    # semantics); non-floating promotions fall back to f32.
    out_dtype = jnp.result_type(inp.dtype, target.dtype)
    if not jnp.issubdtype(out_dtype, jnp.floating):
        out_dtype = jnp.dtype(jnp.float32)

    def canon(a):
        a = jnp.ravel(a)
        # TODO(synk): also pass bool/int8 targets natively (32-sublane tiles)
        # to cut their HBM traffic a further 4x.
        return a if a.dtype in _NATIVE_DTYPES else a.astype(jnp.float32)

    x = canon(inp)
    t = canon(target)

    # Alignment needed so a [rows, 128] view of the flat prefix satisfies every
    # operand's (sublane, 128) tiling constraint.
    sub = max(_sublane_multiple(x.dtype), _sublane_multiple(t.dtype),
              _sublane_multiple(out_dtype) if reduction == "none" else _SUBLANES)
    unit = sub * _LANES

    # No jnp.pad of the full inputs: kernel covers the aligned bulk prefix,
    # the (< unit elements) ragged tail is a tiny jnp expression.
    n_bulk = (n // unit) * unit
    n_tail = n - n_bulk

    tail_loss = None
    if n_tail:
        tail_loss = _bce_f32(x[n_bulk:].astype(jnp.float32),
                             t[n_bulk:].astype(jnp.float32))

    if n_bulk == 0:
        # Tiny input: no aligned bulk, pure-jnp path.
        if reduction == "none":
            return tail_loss.astype(out_dtype).reshape(orig_shape)
        total = jnp.sum(tail_loss)
        if reduction == "sum":
            return total.astype(out_dtype)
        return (total / float(n)).astype(out_dtype)

    rows = n_bulk // _LANES
    x2 = (x if n_tail == 0 else x[:n_bulk]).reshape(rows, _LANES)
    t2 = (t if n_tail == 0 else t[:n_bulk]).reshape(rows, _LANES)

    # Block selection: big lane-dense tiles (>= ~1 MiB / input block already
    # sits near the HBM roofline), rounded to the dtype sublane multiple, and
    # split into >= 2 blocks when the problem is big enough so the "parallel"
    # grid axis can occupy both v7x TensorCores (one extra ~0.35us grid step on
    # single-TC v5e/v6e, i.e. near-free).
    block_rows = min(max_block_rows, rows)
    block_rows = max(sub, (block_rows // sub) * sub)
    if block_rows == rows and rows > 8 * sub:
        block_rows = (((rows + 1) // 2) + sub - 1) // sub * sub

    num_blocks = pl.cdiv(rows, block_rows)
    tail_rows = rows - (num_blocks - 1) * block_rows

    in_specs = [
        pl.BlockSpec((block_rows, _LANES), lambda i: (i, 0)),
        pl.BlockSpec((block_rows, _LANES), lambda i: (i, 0)),
    ]

    in_block_bytes = block_rows * _LANES * (x.dtype.itemsize + t.dtype.itemsize)
    out_block_bytes = (block_rows * _LANES * jnp.dtype(out_dtype).itemsize
                       if reduction == "none" else _SUBLANES * _LANES * 4)
    # Double-buffered footprint + headroom, clamped so it is legal on every
    # generation (v5e 16 MiB scoped default .. v7x 64 MiB physical VMEM).
    vmem_limit = int(min(48 * 1024 * 1024,
                         max(16 * 1024 * 1024,
                             2 * (in_block_bytes + out_block_bytes) + 2 * 1024 * 1024)))
    compiler_params = pltpu.CompilerParams(
        dimension_semantics=("parallel",), vmem_limit_bytes=vmem_limit)

    if reduction == "none":
        loss2d = pl.pallas_call(
            _bce_none_kernel,
            out_shape=jax.ShapeDtypeStruct((rows, _LANES), out_dtype),
            grid=(num_blocks,),
            in_specs=in_specs,
            out_specs=pl.BlockSpec((block_rows, _LANES), lambda i: (i, 0)),
            compiler_params=compiler_params,
        )(x2, t2)
        flat = loss2d.reshape(-1)
        if n_tail:
            flat = jnp.concatenate([flat, tail_loss.astype(out_dtype)])
        return flat.reshape(orig_shape)

    kernel = functools.partial(
        _bce_partial_sum_kernel,
        last_block_rows=None if tail_rows == block_rows else tail_rows)
    partials = pl.pallas_call(
        kernel,
        out_shape=jax.ShapeDtypeStruct((num_blocks * _SUBLANES, _LANES), jnp.float32),
        grid=(num_blocks,),
        in_specs=in_specs,
        out_specs=pl.BlockSpec((_SUBLANES, _LANES), lambda i: (i, 0)),
        compiler_params=compiler_params,
    )(x2, t2)

    total = jnp.sum(partials)
    if n_tail:
        total = total + jnp.sum(tail_loss)
    if reduction == "sum":
        return total.astype(out_dtype)
    # Divisor computed in Python (double) then one f32 divide; for very large n
    # the f32 grand sum dominates any divisor rounding (matches torch f32).
    return (total / float(n)).astype(out_dtype)


def _ref_loss(x, t):
    xc = jnp.clip(x.astype(jnp.float32), _EPS, 1.0 - _EPS)
    tf = t.astype(jnp.float32)
    return -(tf * jnp.log(xc) + (1.0 - tf) * jnp.log(1.0 - xc))


if __name__ == "__main__":
    key = jax.random.PRNGKey(0)
    k1, k2 = jax.random.split(key, 2)

    def check(shape, **kw):
        inp = jax.random.uniform(k1, shape, dtype=jnp.float32)
        tgt = (jax.random.uniform(k2, shape) > 0.5).astype(jnp.float32)
        ref = _ref_loss(inp, tgt)
        out_none = jax.block_until_ready(custom_bce_loss(inp, tgt, "none", **kw))
        out_sum = jax.block_until_ready(custom_bce_loss(inp, tgt, "sum", **kw))
        out_mean = jax.block_until_ready(custom_bce_loss(inp, tgt, "mean", **kw))
        assert out_none.shape == shape and out_none.dtype == ref.dtype
        assert jnp.allclose(out_none, ref, rtol=1e-5, atol=1e-6)
        assert jnp.allclose(out_sum, ref.sum(), rtol=1e-4, atol=1e-3)
        assert jnp.allclose(out_mean, ref.mean(), rtol=1e-4, atol=1e-6)

    # Primary NCHW demo: aligned size -> kernel touches HBM exactly once, no tail.
    check((2, 4, 16, 16))
    # Ragged tiny input -> pure-jnp tail-only path.
    check((3, 5, 7))
    # Multi-block grid with a partial last block -> exercises the pl.when row
    # mask in the partial-sum kernel and the masked 'none' writeback.
    check((3, 1024), max_block_rows=16)
    # Kernel bulk + ragged jnp tail combined in the wrapper.
    check((8, 1000))
    # Rows large enough to trigger the >=2-block (v7x megacore) auto-split.
    check((128, 320))

    print("KERNEL_OK")
</pallas_src>

<mosaic_0001>
module attributes {stable_mosaic.version = 11 : i64} {
  func.func @_bce_none_kernel(%arg0: i32, %arg1: memref<16x128xf32, #tpu.memory_space<vmem>>, %arg2: memref<16x128xf32, #tpu.memory_space<vmem>>, %arg3: memref<16x128xf32, #tpu.memory_space<vmem>>) attributes {dimension_semantics = [#tpu.dimension_semantics<parallel>], iteration_bounds = array<i64: 1>, scalar_prefetch = 0 : i64, scratch_operands = 0 : i64, tpu.core_type = #tpu.core_type<tc>, window_params = [{transform_indices = @transform_0, window_bounds = array<i64: 16, 128>}, {transform_indices = @transform_1, window_bounds = array<i64: 16, 128>}, {transform_indices = @transform_2, window_bounds = array<i64: 16, 128>}]} {
    %c0 = arith.constant 0 : index
    %c0_0 = arith.constant 0 : index
    %0 = vector.load %arg1[%c0, %c0_0] : memref<16x128xf32, #tpu.memory_space<vmem>>, vector<16x128xf32>
    %c0_1 = arith.constant 0 : index
    %c0_2 = arith.constant 0 : index
    %1 = vector.load %arg2[%c0_1, %c0_2] : memref<16x128xf32, #tpu.memory_space<vmem>>, vector<16x128xf32>
    %cst = arith.constant 1.000000e-07 : f32
    %cst_3 = arith.constant 0.99999988 : f32
    %2 = vector.broadcast %cst : f32 to vector<16x128xf32>
    %3 = arith.maximumf %2, %0 : vector<16x128xf32>
    %4 = vector.broadcast %cst_3 : f32 to vector<16x128xf32>
    %5 = arith.minimumf %4, %3 : vector<16x128xf32>
    %6 = math.log %5 : vector<16x128xf32>
    %7 = arith.mulf %1, %6 : vector<16x128xf32>
    %cst_4 = arith.constant 1.000000e+00 : f32
    %8 = vector.broadcast %cst_4 : f32 to vector<16x128xf32>
    %9 = arith.subf %8, %1 : vector<16x128xf32>
    %cst_5 = arith.constant 1.000000e+00 : f32
    %10 = vector.broadcast %cst_5 : f32 to vector<16x128xf32>
    %11 = arith.subf %10, %5 : vector<16x128xf32>
    %12 = math.log %11 : vector<16x128xf32>
    %13 = arith.mulf %9, %12 : vector<16x128xf32>
    %14 = arith.addf %7, %13 : vector<16x128xf32>
    %cst_6 = arith.constant 0.000000e+00 : f32
    %15 = vector.broadcast %cst_6 : f32 to vector<16x128xf32>
    %16 = arith.subf %15, %14 : vector<16x128xf32>
    %c0_7 = arith.constant 0 : index
    %c0_8 = arith.constant 0 : index
    %17 = vector.load %arg3[%c0_7, %c0_8] : memref<16x128xf32, #tpu.memory_space<vmem>>, vector<16x128xf32>
    tpu.vector_store %arg3[%c0_7, %c0_8], %16 {strides = array<i32>} : memref<16x128xf32, #tpu.memory_space<vmem>>, vector<16x128xf32>,
    return
  }
  func.func @transform_0(%arg0: i32) -> (i32, i32) {
    %c0_i32 = arith.constant 0 : i32
    %c0_i32_0 = arith.constant 0 : i32
    return %arg0, %c0_i32 : i32, i32
  }
  func.func @transform_1(%arg0: i32) -> (i32, i32) {
    %c0_i32 = arith.constant 0 : i32
    %c0_i32_0 = arith.constant 0 : i32
    return %arg0, %c0_i32 : i32, i32
  }
  func.func @transform_2(%arg0: i32) -> (i32, i32) {
    %c0_i32 = arith.constant 0 : i32
    %c0_i32_0 = arith.constant 0 : i32
    return %arg0, %c0_i32 : i32, i32
  }
}

</mosaic_0001>

<bundles_post_ra>
// kernel: tpu_custom_call.1
= control target key start
LH: loop header
LB: loop body
LE: loop exit
PB: predicated region body
PF: predicated region fallthrough
CT: control target
= control target key end

     0   :  { %7 = vsyncpa [#allocation3], 0  ;;  %s205_s0 = inlined_call_operand.hbm [shape: f32[16,128], index: 0, kind: input, shape index: {}]   ;;  %s206_s1 = inlined_call_operand.hbm [shape: f32[16,128], index: 1, kind: input, shape index: {}]   ;;  %s207_s2 = inlined_call_operand.hbm [shape: f32[16,128], index: 2, kind: output, shape index: {}]  }
   0x1   :  { %8 = vsyncpa [#allocation6], 0 }
   0x2   :  { %9 = vsyncpa [#allocation4], 0  ;;  %s167_s9 = smov [#allocation2]  }
   0x3   :  { %s15_s10 = sshll.u32 %s167_s9, 4  ;;  %s16_s10 = int_to_ptr.vmem [resolvable:$true] %s15_s10 }
   0x4   :  { %s109_s11 = scalar_lea.vmem %s16_s10, 256  ;;  %p114_p1 = scmp.lt.s32.totalorder %s16_s10, %s16_s10 }
   0x5   :  { %p110_p0 = scmp.ne.s32.totalorder %s16_s10, %s109_s11  ;;  %p115_p2 = scmp.lt.s32.totalorder %s109_s11, %s109_s11 }
   0x7   :  { %p116_p3 = por %p115_p2, %p114_p1 }
   0x9   :  { %p117_p4 = pnand %p116_p3, %p110_p0 }
   0xb   :  { %120 = shalt.err (!%p117_p4)
}
   0xc   :  { %s168_s12 = smov 128   ;;  %s169_s13 = smov 8  }
   0xd   :  { %21 = dma.hbm_to_vmem [thread:$0]  %s205_s0, 256, %s16_s10, [#allocation3], %s168_s12, %s168_s12, %s169_s13  }
   0xe   :  { %s170_s16 = smov [#allocation5]  }
   0xf   :  { %s27_s17 = sshll.u32 %s170_s16, 4  ;;  %s28_s17 = int_to_ptr.vmem [resolvable:$true] %s27_s17 }
  0x10   :  { %s129_s18 = scalar_lea.vmem %s28_s17, 256  ;;  %p134_p6 = scmp.lt.s32.totalorder %s28_s17, %s28_s17 }
  0x11   :  { %p130_p5 = scmp.ne.s32.totalorder %s28_s17, %s129_s18  ;;  %p135_p7 = scmp.lt.s32.totalorder %s129_s18, %s129_s18 }
  0x13   :  { %p136_p8 = por %p135_p7, %p134_p6 }
  0x15   :  { %p137_p9 = pnand %p136_p8, %p130_p5 }
  0x17   :  { %140 = shalt.err (!%p137_p9)
}
  0x18   :  { %33 = dma.hbm_to_vmem [thread:$0]  %s206_s1, 256, %s28_s17, [#allocation6], %s168_s12, %s168_s12, %s169_s13  }
  0x19   :  { %161 = dma.done.wait [#allocation3], 256  }
  0x1a   :  { %162 = vsyncadd [#allocation3], 4294967040 }
  0x1b   :  { %163 = dma.done.wait [#allocation6], 256  }
  0x1c   :  { %164 = vsyncadd [#allocation6], 4294967040  ;;  %v40_v0 = vld [vmem:[#allocation2] sm:$0xff]  ;;  %v41_v1 = vld [vmem:[#allocation2 + $0x8] sm:$0xff]  ;;  %s171_s0 = smov [#allocation7]  }
  0x1d   :  { %v44_v2 = vmax.f32 %v40_v0, 1e-07  ;;  %v45_v3 = vmax.f32 %v41_v1, 1e-07  ;;  %v42_v8 = vld [vmem:[#allocation5] sm:$0xff]  ;;  %v43_v9 = vld [vmem:[#allocation5 + $0x8] sm:$0xff] }
  0x1e   :  { %v54_v13 = vsub.f32 1.0, %v42_v8  ;;  %v55_v16 = vsub.f32 1.0, %v43_v9  ;;  %s75_s1 = sshll.u32 %s171_s0, 4  ;;  %s76_s1 = int_to_ptr.vmem [resolvable:$true] %s75_s1 }
  0x1f   :  { %v46_v4 = vmin.f32 %v44_v2, 0.9999999  ;;  %v47_v5 = vmin.f32 %v45_v3, 0.9999999  ;;  %s141_s21 = scalar_lea.vmem %s76_s1, 256  ;;  %p146_p11 = scmp.lt.s32.totalorder %s76_s1, %s76_s1 }
  0x20   :  { %p142_p10 = scmp.ne.s32.totalorder %s76_s1, %s141_s21  ;;  %p147_p12 = scmp.lt.s32.totalorder %s141_s21, %s141_s21 }
  0x21   :  { %93 = vlog2.f32 %v46_v4  ;;  %v56_v6 = vsub.f32 1.0, %v46_v4  ;;  %v57_v7 = vsub.f32 1.0, %v47_v5 }
  0x22   :  { %95 = vlog2.f32 %v47_v5  ;;  %p148_p13 = por %p147_p12, %p146_p11 }
  0x23   :  { %97 = vlog2.f32 %v56_v6 }
  0x24   :  { %99 = vlog2.f32 %v57_v7  ;;  %p149_p0 = pnand %p148_p13, %p142_p10 }
  0x2e   :  { %v94_v10 = vpop.eup %93 }
  0x2f   :  { %v96_v11 = vpop.eup %95  ;;  %v49_v12 = vmul.f32 0.6931472, %v94_v10 }
  0x30   :  { %v98_v14 = vpop.eup %97  ;;  %v51_v15 = vmul.f32 0.6931472, %v96_v11 }
  0x31   :  { %v100_v17 = vpop.eup %99  ;;  %v52_v18 = vmul.f32 %v49_v12, %v42_v8  ;;  %v59_v19 = vmul.f32 0.6931472, %v98_v14 }
  0x32   :  { %v53_v20 = vmul.f32 %v51_v15, %v43_v9  ;;  %v61_v21 = vmul.f32 0.6931472, %v100_v17 }
  0x33   :  { %v62_v22 = vmul.f32 %v59_v19, %v54_v13 }
  0x34   :  { %v63_v23 = vmul.f32 %v61_v21, %v55_v16 }
  0x35   :  { %v64_v24 = vadd.f32 %v62_v22, %v52_v18 }
  0x36   :  { %v65_v25 = vadd.f32 %v63_v23, %v53_v20 }
  0x37   :  { %v66_v26 = vsub.f32 0.0, %v64_v24 }
  0x38   :  { %v67_v27 = vsub.f32 0.0, %v65_v25 }
  0x39   :  { %68 = vst [vmem:[#allocation7] sm:$0xff] %v66_v26 }
  0x3a   :  { %69 = vst [vmem:[#allocation7 + $0x8] sm:$0xff] %v67_v27 }
  0x3b   :  { %152 = shalt.err (!%p149_p0)
}
  0x3c   :  { %81 = dma.vmem_to_hbm [thread:$0]  %s76_s1, 256, %s207_s2, [#allocation4], %s168_s12, %s168_s12, %s169_s13  }
  0x3d   :  { %165 = dma.done.wait [#allocation4], 256  }
  0x3e   :  { %166 = vsyncadd [#allocation4], 4294967040 }
  0x3f   :  { %85 = vsyncpa [#allocation3], 1 }
  0x40   :  { %86 = vsyncpa [#allocation6], 1 }
  0x41   :  { %87 = vsyncpa [#allocation4], 1 }

</bundles_post_ra>
